<compile_context>
chip_gen: v7x
topology: tpu7x:2x2x1
jax: 0.10.0
libtpu: 0.0.40
codegen_flags: <defaults>
</compile_context>

<pallas_src>
import functools

import jax
import jax.numpy as jnp
from jax.experimental import pallas as pl
from jax.experimental.pallas import tpu as pltpu

_EPS = 1e-7
# ~4 MiB of *physically padded* VMEM per block (see header note).
_TARGET_BLOCK_BYTES = 4 * 1024 * 1024
# 4 double-buffered blocks (in+out) + ~3 f32 temporaries ~= 28 MiB worst case;
# 48 MiB leaves headroom and is safe on v5e/v6e (128 MiB) and v7x (64 MiB).
_VMEM_LIMIT_BYTES = 48 * 1024 * 1024


def _round_up(x: int, m: int) -> int:
    return ((x + m - 1) // m) * m


def _sublane_multiple(dtype) -> int:
    # Native packed tiling: (8,128) f32, (16,128) bf16, (32,128) int8/fp8.
    return max(8, 32 // max(1, jnp.dtype(dtype).itemsize))


def _channel_norm_kernel(x_ref, o_ref, *, power: int):
    # x_ref: (1, C, TILE_HW) block in VMEM.  Reduce over the channel axis
    # (axis=1, sublanes); the spatial axis stays lane-dense -> unmasked stores.
    x = x_ref[...]
    xf = x.astype(jnp.float32)
    if power == 2:
        s = jnp.sum(xf * xf, axis=1, keepdims=True)
        norm = jnp.sqrt(s)
    else:
        # TODO(synk): odd `power` with negative inputs yields NaN via s**(1/power) (matches PyTorch).
        s = jnp.sum(xf ** power, axis=1, keepdims=True)
        norm = s ** (1.0 / power)
    inv = pl.reciprocal(norm + _EPS, approx=False)
    # Big multiply in the input dtype (no second full-tile f32 temporary).
    o_ref[...] = (x * inv.astype(x.dtype)).astype(o_ref.dtype)


def _lastaxis_norm_kernel(x_ref, o_ref, *, power: int):
    # x_ref: (TILE_B, C) block; reduce over the last (lane) axis.
    x = x_ref[...]
    xf = x.astype(jnp.float32)
    if power == 2:
        s = jnp.sum(xf * xf, axis=-1, keepdims=True)
        norm = jnp.sqrt(s)
    else:
        s = jnp.sum(xf ** power, axis=-1, keepdims=True)
        norm = s ** (1.0 / power)
    inv = pl.reciprocal(norm + _EPS, approx=False)
    o_ref[...] = (x * inv.astype(x.dtype)).astype(o_ref.dtype)


def _normalize_nchw(x: jax.Array, power: int) -> jax.Array:
    b, c, h, w = x.shape
    hw = h * w
    x3 = x.reshape(b, c, hw)  # contiguous view: free, no HBM transpose pass

    itemsize = jnp.dtype(x.dtype).itemsize
    sub = _sublane_multiple(x.dtype)
    c_pad = _round_up(c, sub)  # physical sublane padding of the (1,C,TILE) block
    target_lanes = max(128, (_TARGET_BLOCK_BYTES // (c_pad * itemsize)) // 128 * 128)
    hw_r = _round_up(hw, 128)
    n_tiles = max(1, pl.cdiv(hw_r, target_lanes))
    if b * n_tiles < 2 and hw_r >= 256:
        n_tiles = 2  # keep both v7x TensorCores busy
    tile_hw = _round_up(pl.cdiv(hw_r, n_tiles), 128)
    grid_hw = pl.cdiv(hw, tile_hw)  # ragged last block handled by Pallas masking

    out3 = pl.pallas_call(
        functools.partial(_channel_norm_kernel, power=power),
        out_shape=jax.ShapeDtypeStruct((b, c, hw), x.dtype),
        grid=(b, grid_hw),
        in_specs=[pl.BlockSpec((1, c, tile_hw), lambda i, j: (i, 0, j))],
        out_specs=pl.BlockSpec((1, c, tile_hw), lambda i, j: (i, 0, j)),
        compiler_params=pltpu.CompilerParams(
            dimension_semantics=("parallel", "parallel"),
            vmem_limit_bytes=_VMEM_LIMIT_BYTES,
        ),
    )(x3)
    return out3.reshape(b, c, h, w)


def _normalize_2d(x: jax.Array, power: int) -> jax.Array:
    b, c = x.shape
    itemsize = jnp.dtype(x.dtype).itemsize
    sub = _sublane_multiple(x.dtype)
    c_lanes = _round_up(c, 128)  # physical lane padding of the block
    target_rows = max(sub, (_TARGET_BLOCK_BYTES // (c_lanes * itemsize)) // sub * sub)
    b_r = _round_up(b, sub)
    n_tiles = max(1, pl.cdiv(b_r, target_rows))
    if n_tiles < 2 and b_r >= 2 * sub:
        n_tiles = 2  # two grid steps so both v7x TensorCores get work
    tile_b = _round_up(pl.cdiv(b_r, n_tiles), sub)
    grid_b = pl.cdiv(b, tile_b)  # ragged last block handled by Pallas masking

    return pl.pallas_call(
        functools.partial(_lastaxis_norm_kernel, power=power),
        out_shape=jax.ShapeDtypeStruct((b, c), x.dtype),
        grid=(grid_b,),
        in_specs=[pl.BlockSpec((tile_b, c), lambda i: (i, 0))],
        out_specs=pl.BlockSpec((tile_b, c), lambda i: (i, 0)),
        compiler_params=pltpu.CompilerParams(
            dimension_semantics=("parallel",),
            vmem_limit_bytes=_VMEM_LIMIT_BYTES,
        ),
    )(x)


def normalize(x: jax.Array, power: int = 2) -> jax.Array:
    """Pallas equivalent of Normalize(power).forward(x); normalizes across dim 1.

    Accepts NCHW (B, C, H, W) or 2-D (B, C).
    """
    if x.ndim == 4:
        return _normalize_nchw(x, power)
    if x.ndim == 2:
        return _normalize_2d(x, power)
    raise ValueError(f"unsupported rank {x.ndim}")


def _reference(x: jax.Array, power: int = 2) -> jax.Array:
    norm = jnp.power(jnp.sum(jnp.power(x, power), axis=1, keepdims=True), 1.0 / power)
    return x / (norm + _EPS)


if __name__ == "__main__":
    key = jax.random.PRNGKey(0)
    k0, k1, k2 = jax.random.split(key, 3)

    # Small NCHW input consistent with how Normalize is used on conv features.
    x = jax.random.normal(k0, (2, 4, 16, 16), dtype=jnp.float32)
    out = jax.block_until_ready(normalize(x, power=2))
    ref = _reference(x, power=2)
    assert out.shape == x.shape and out.dtype == x.dtype
    assert jnp.allclose(out, ref, atol=1e-5, rtol=1e-5), float(jnp.max(jnp.abs(out - ref)))

    # H*W NOT a multiple of 128 -> exercises the masked boundary block
    # (no HBM-level pad / slice anymore).
    xr = jax.random.normal(k1, (2, 4, 14, 14), dtype=jnp.float32)
    outr = jax.block_until_ready(normalize(xr, power=2))
    refr = _reference(xr, power=2)
    assert outr.shape == xr.shape and outr.dtype == xr.dtype
    assert jnp.allclose(outr, refr, atol=1e-5, rtol=1e-5), float(jnp.max(jnp.abs(outr - refr)))

    # 2-D feature-vector path (B, C) with lane-dense channels.
    x2 = jax.random.normal(k2, (6, 256), dtype=jnp.float32)
    out2 = jax.block_until_ready(normalize(x2, power=2))
    ref2 = _reference(x2, power=2)
    assert out2.shape == x2.shape and out2.dtype == x2.dtype
    assert jnp.allclose(out2, ref2, atol=1e-5, rtol=1e-5), float(jnp.max(jnp.abs(out2 - ref2)))

    print("KERNEL_OK")
</pallas_src>

<mosaic_0001>
module attributes {stable_mosaic.version = 11 : i64} {
  func.func @_channel_norm_kernel(%arg0: i32, %arg1: i32, %arg2: memref<1x4x256xf32, #tpu.memory_space<vmem>>, %arg3: memref<1x4x256xf32, #tpu.memory_space<vmem>>) attributes {dimension_semantics = [#tpu.dimension_semantics<parallel>, #tpu.dimension_semantics<parallel>], iteration_bounds = array<i64: 2, 1>, scalar_prefetch = 0 : i64, scratch_operands = 0 : i64, tpu.core_type = #tpu.core_type<tc>, window_params = [{transform_indices = @transform_0, window_bounds = array<i64: 1, 4, 256>}, {transform_indices = @transform_1, window_bounds = array<i64: 1, 4, 256>}]} {
    %c0 = arith.constant 0 : index
    %c0_0 = arith.constant 0 : index
    %c0_1 = arith.constant 0 : index
    %0 = vector.load %arg2[%c0, %c0_0, %c0_1] : memref<1x4x256xf32, #tpu.memory_space<vmem>>, vector<1x4x256xf32>
    %1 = arith.mulf %0, %0 : vector<1x4x256xf32>
    %cst = arith.constant dense<0.000000e+00> : vector<1x256xf32>
    %2 = vector.multi_reduction <add>, %1, %cst [1] : vector<1x4x256xf32> to vector<1x256xf32>
    %3 = vector.shape_cast %2 : vector<1x256xf32> to vector<1x1x256xf32>
    %4 = math.sqrt %3 : vector<1x1x256xf32>
    %cst_2 = arith.constant 1.000000e-07 : f32
    %5 = vector.broadcast %cst_2 : f32 to vector<1x1x256xf32>
    %6 = arith.addf %4, %5 : vector<1x1x256xf32>
    %7 = tpu.reciprocal %6 : vector<1x1x256xf32> -> vector<1x1x256xf32>
    %8 = vector.broadcast %7 : vector<1x1x256xf32> to vector<1x4x256xf32>
    %9 = arith.mulf %0, %8 : vector<1x4x256xf32>
    %c0_3 = arith.constant 0 : index
    %c0_4 = arith.constant 0 : index
    %c0_5 = arith.constant 0 : index
    %10 = vector.load %arg3[%c0_3, %c0_4, %c0_5] : memref<1x4x256xf32, #tpu.memory_space<vmem>>, vector<1x4x256xf32>
    tpu.vector_store %arg3[%c0_3, %c0_4, %c0_5], %9 {strides = array<i32>} : memref<1x4x256xf32, #tpu.memory_space<vmem>>, vector<1x4x256xf32>,
    return
  }
  func.func @transform_0(%arg0: i32, %arg1: i32) -> (i32, i32, i32) {
    %c0_i32 = arith.constant 0 : i32
    %c0_i32_0 = arith.constant 0 : i32
    return %arg0, %c0_i32, %arg1 : i32, i32, i32
  }
  func.func @transform_1(%arg0: i32, %arg1: i32) -> (i32, i32, i32) {
    %c0_i32 = arith.constant 0 : i32
    %c0_i32_0 = arith.constant 0 : i32
    return %arg0, %c0_i32, %arg1 : i32, i32, i32
  }
}

</mosaic_0001>

<bundles_post_ra>
// kernel: tpu_custom_call.1
= control target key start
LH: loop header
LB: loop body
LE: loop exit
PB: predicated region body
PF: predicated region fallthrough
CT: control target
= control target key end

     0   :  { %6 = vsyncpa [#allocation3], 0  ;;  %s687_s0 = inlined_call_operand.hbm [shape: f32[2,4,256], index: 0, kind: input, shape index: {}]   ;;  %s688_s1 = inlined_call_operand.hbm [shape: f32[2,4,256], index: 1, kind: output, shape index: {}]  }
   0x1   :  { %8 = vsyncpa [#allocation3 + $0x1], 0 }
   0x2   :  { %9 = vsyncpa [#allocation4], 0 }
   0x3   :  { %11 = vsyncpa [#allocation4 + $0x1], 0  ;;  %s511_s6 = smov 0   ;;  %s513_s7 = smov 0  }
   0x4   :  { %s515_s8 = smov 0   ;;  %s517_s9 = smov 0  }
   0x5   :  { %s519_s10 = smov 0   ;;  %s521_s11 = smov 0  }
   0x6 LB: > { %s298_s12 = sadd.s32 4294967295, %s497_s11   ;;  %s299_s13 = sadd.s32 4294967294, %s497_s11   ;;  %s497_s11 = sphi %s521_s11, %s17_s11   ;;  %s493_s10 = sphi %s519_s10, %s704_s10   ;;  %s489_s9 = sphi %s517_s9, %s703_s9   ;;  %s485_s8 = sphi %s515_s8, %s702_s8   ;;  %s481_s7 = sphi %s513_s7, %s701_s7   ;;  %s477_s6 = sphi %s511_s6, %s700_s6  }
   0x7   : > { %s29_s14 = sadd.s32 1, %s493_s10  ;;  %s38_s15 = sadd.s32 1, %s485_s8 }
   0x8   : > { %p31_p0 = scmp.ge.s32.totalorder %s29_s14, 2  ;;  %p45_p1 = scmp.ne.s32.totalorder %s485_s8, %s481_s7 }
   0x9   : > { %p46_p2 = scmp.eq.s32.totalorder %s497_s11, 0  ;;  %p51_p3 = scmp.ne.s32.totalorder %s481_s7, %s477_s6 }
   0xa   : > { %s706_s14 = smov (%p31_p0, %s29_s14), 0  ;;  %p52_p5 = scmp.eq.s32.totalorder %s298_s12, 0 }
   0xb   : > { %p552_p4 = por %p46_p2, %p45_p1  ;;  %s33_s17 = ssub.s32 %s493_s10, %s706_s14 }
   0xc   : > { %p77_p6 = scmp.eq.s32.totalorder %s298_s12, 1  ;;  %p36_p7 = scmp.eq.s32.totalorder %s33_s17, 0 }
   0xd   : > { %p558_p8 = por %p52_p5, %p51_p3  ;;  %p83_p10 = scmp.eq.s32.totalorder %s299_s13, 1 }
   0xe   : > { %p562_p9 = por %p77_p6, %p45_p1  ;;  %p327_p13 = scmp.lt.s32.totalorder %s497_s11, 2 }
   0xf   : > { %s567_s20 = scalar_select %p36_p7, %s485_s8, %s38_s15  }
  0x10   : > { %s692_s19 = scalar_select %p562_p9, 1, 0 }
  0x11   : > { %p569_p11 = por %p83_p10, %p51_p3  ;;  %s103_s22 = sand.u32 1, %s485_s8  }
  0x12   : > { %s302_s23 = sshll.u32 %s103_s22, 3  ;;  %s313_s24 = sshll.u32 %s493_s10, 7 }
  0x13   : > { %s693_s21 = scalar_select %p569_p11, 1, 0 }
  0x14   : > { %s580_s27 = scalar_lea.hbm %s687_s0, %s313_s24  ;;  %s107_s28 = scalar_lea.vmem [#allocation2], %s302_s23 }
  0x15   : > { %s117_s29 = sshll.u32 %s107_s28, 4  ;;  %p586_p0 = pnand %p327_p13, %p552_p4  ;;  %s582_s29 = int_to_ptr.vmem [resolvable:$true] %s117_s29 }
  0x16   : > { %s104_s2 = scalar_lea.sflag [#allocation3], %s103_s22  ;;  %s385_s3 = scalar_lea.hbm %s580_s27, 128 }
  0x17   : > { %p386_p3 = scmp.ne.s32.totalorder %s580_s27, %s385_s3  ;;  %p387_p5 = pneg %p586_p0 }
  0x18   : > { %s390_s12 = scalar_lea.hbm %s687_s0, 256  ;;  %p391_p4 = scmp.lt.u32.totalorder %s580_s27, %s687_s0 }
  0x19   : > { %p388_p6 = pnand %p387_p5, %p386_p3  ;;  %p392_p10 = scmp.lt.u32.totalorder %s390_s12, %s385_s3 }
  0x1a   : > { %p394_p12 = scmp.lt.u32.totalorder %s385_s3, %s580_s27 }
  0x1b   : > { %p389_p7 = pneg %p388_p6  ;;  %p393_p13 = por %p392_p10, %p391_p4 }
  0x1d   : > { %p395_p1 = por %p394_p12, %p393_p13 }
  0x1f   : > { %p396_p2 = pnand %p395_p1, %p389_p7 }
  0x21   : > { %399 = shalt.err (!%p396_p2)
}
  0x22   : > { %s400_s16 = scalar_lea.vmem %s582_s29, 128  ;;  %s499_s17 = smov [#allocation2]  }
  0x23   : > { %p401_p3 = scmp.ne.s32.totalorder %s582_s29, %s400_s16  ;;  %s405_s22 = sshll.u32 %s499_s17, 4  ;;  %s406_s22 = int_to_ptr.vmem [resolvable:$false] %s405_s22 }
  0x24   : > { %s407_s23 = scalar_lea.vmem %s406_s22, 256  ;;  %p408_p9 = scmp.lt.s32.totalorder %s582_s29, %s406_s22 }
  0x25   : > { %p403_p6 = pnand %p401_p3, %p387_p5  ;;  %p409_p4 = scmp.lt.s32.totalorder %s407_s23, %s400_s16 }
  0x27   : > { %p404_p11 = pneg %p403_p6  ;;  %p410_p10 = por %p409_p4, %p408_p9 }
  0x29   : > { %p411_p12 = pnand %p410_p10, %p404_p11 }
  0x2b   : > { %414 = shalt.err (!%p411_p12)
}
  0x2c   : > { %322 = dma.hbm_to_vmem [thread:$0]  (!%p586_p0), %s580_s27, 128, %s582_s29, %s104_s2  }
  0x2d   : > { %p695_p1 = scmp.lt.s32.totalorder %s497_s11, 3  ;;  %p696_p2 = scmp.ge.s32.totalorder %s497_s11, 1 }
  0x2f   : > { %p123_p5 = pnand %p696_p2, %p695_p1 }
  0x30   : > { %s622_s24 = sand.u32 (!%p123_p5), 1, %s481_s7  }
  0x31   : > { %126 = sbr.rel (%p123_p5) target bundleno = 121 (0x79), region = 24  ;;  %s306_s25 = sshll.u32 (!%p123_p5), %s622_s24, 3 }
  0x32   : > { %s129_s26 = scalar_lea.sflag (!%p123_p5), [#allocation3], %s622_s24  ;;  %s132_s28 = scalar_lea.vmem (!%p123_p5), [#allocation2], %s306_s25 }
  0x38   : > { %468 = dma.done.wait (%p558_p8), %s129_s26, 128  }
  0x39   : > { %470 = vsyncadd (%p558_p8), %s129_s26, 4294967168  ;;  %v153_v0 = vld [vmem:[%s132_s28] sm:$0xff]  ;;  %vm158_vm0 = vcmask 1043456   ;;  %s150_s18 = scalar_lea.vmem [#allocation5], %s306_s25  ;;  %s314_s29 = sshll.u32 %s489_s9, 7 }
  0x3a   : > { %v154_v1 = vmul.f32 %v153_v0, %v153_v0  ;;  %s214_s27 = sshll.u32 %s150_s18, 4  ;;  %s640_s3 = scalar_lea.hbm %s688_s1, %s314_s29  ;;  %s635_s27 = int_to_ptr.vmem [resolvable:$true] %s214_s27 }
  0x3b   : > { %s198_s4 = scalar_lea.sflag [#allocation4], %s622_s24  ;;  %s415_s5 = scalar_lea.vmem %s635_s27, 128 }
  0x3c   : > { %v156_v2 = vcombine.high %v154_v1, %v154_v1  ;;  %v159_v3 = vsel %vm158_vm0, %v154_v1, 0.0  ;;  %p416_p8 = scmp.ne.s32.totalorder %s635_s27, %s415_s5  ;;  %p697_p9 = scmp.ne.s32.totalorder %s692_s19, 0 }
  0x3d   : > { %v160_v4 = vrot.slane %v159_v3, 4  ;;  %s500_s9 = smov [#allocation5]  }
  0x3e   : > { %v166_v5 = vsel %vm158_vm0, %v156_v2, 0.0  ;;  %p417_p11 = pnand %p416_p8, %p697_p9  ;;  %s419_s12 = sshll.u32 %s500_s9, 4  ;;  %s420_s12 = int_to_ptr.vmem [resolvable:$false] %s419_s12 }
  0x3f   : > { %v161_v6 = vadd.f32 %v160_v4, %v159_v3  ;;  %v167_v7 = vrot.slane %v166_v5, 4  ;;  %s421_s13 = scalar_lea.vmem %s420_s12, 256  ;;  %p422_p7 = scmp.lt.s32.totalorder %s635_s27, %s420_s12 }
  0x40   : > { %p418_p0 = pneg %p417_p11  ;;  %p423_p13 = scmp.lt.s32.totalorder %s421_s13, %s415_s5 }
  0x41   : > { %v162_v8 = vrot.slane %v161_v6, 2  ;;  %v168_v9 = vadd.f32 %v167_v7, %v166_v5 }
  0x42   : > { %p424_p3 = por %p423_p13, %p422_p7 }
  0x43   : > { %v163_v10 = vadd.f32 %v162_v8, %v161_v6  ;;  %v169_v11 = vrot.slane %v168_v9, 2 }
  0x44   : > { %p425_p6 = pnand %p424_p3, %p418_p0 }
  0x45   : > { %v164_v12 = vrot.slane %v163_v10, 1  ;;  %v170_v13 = vadd.f32 %v169_v11, %v168_v9 }
  0x47   : > { %v165_v14 = vadd.f32 %v164_v12, %v163_v10  ;;  %v171_v15 = vrot.slane %v170_v13, 1 }
  0x49   : > { %v172_v16 = vadd.f32 %v171_v15, %v170_v13  ;;  %377 = vrsqrt.f32 %v165_v14  ;;  %vm175_vm1 = vcmp.eq.f32.partialorder %v165_v14, inf  ;;  %v178_v18 = vand.u32 2147483648, %v165_v14 }
  0x4a   : > { %vm177_vm2 = vcmp.eq.f32.partialorder %v165_v14, 0.0 }
  0x4b   : > { %379 = vrsqrt.f32 %v172_v16  ;;  %vm182_vm3 = vcmp.eq.f32.partialorder %v172_v16, inf  ;;  %v185_v21 = vand.u32 2147483648, %v172_v16  ;;  %vm184_vm4 = vcmp.eq.f32.partialorder %v172_v16, 0.0 }
  0x53   : > { %v378_v17 = vpop.eup %377 }
  0x54   : > { %v174_v19 = vmul.f32 %v378_v17, %v165_v14 }
  0x55   : > { %v380_v20 = vpop.eup %379 }
  0x56   : > { %v176_v22 = vsel %vm175_vm1, %v165_v14, %v174_v19  ;;  %v181_v23 = vmul.f32 %v380_v20, %v172_v16 }
  0x57   : > { %v179_v24 = vsel %vm177_vm2, %v178_v18, %v176_v22 }
  0x58   : > { %v183_v25 = vsel %vm182_vm3, %v172_v16, %v181_v23  ;;  %v187_v26 = vadd.f32 1e-07, %v179_v24 }
  0x59   : > { %v186_v27 = vsel %vm184_vm4, %v185_v21, %v183_v25 }
  0x5a   : > { %v188_v28 = vadd.f32 1e-07, %v186_v27  ;;  %381 = vrcp.f32 %v187_v26 }
  0x5c   : > { %383 = vrcp.f32 %v188_v28 }
  0x64   : > { %v382_v29 = vpop.eup %381 }
  0x66   : > { %v384_v30 = vpop.eup %383 }
  0x67   : > { %v193_v31 = vcombine.low %v382_v29, %v384_v30 }
  0x69   : > { %v195_v32 = vmul.f32 %v193_v31, %v153_v0 }
  0x6b   : > { %196 = vst [vmem:[%s150_s18] sm:$0xff] %v195_v32 }
  0x6c   : > { %428 = shalt.err (!%p425_p6)
}
  0x6d   : > { %s429_s15 = scalar_lea.hbm %s640_s3, 128  ;;  %s433_s22 = scalar_lea.hbm %s688_s1, 256 }
  0x6e   : > { %p430_p4 = scmp.ne.s32.totalorder %s640_s3, %s429_s15  ;;  %p434_p1 = scmp.lt.u32.totalorder %s640_s3, %s688_s1 }
  0x6f   : > { %p435_p2 = scmp.lt.u32.totalorder %s433_s22, %s429_s15  ;;  %p437_p8 = scmp.lt.u32.totalorder %s429_s15, %s640_s3 }
  0x70   : > { %p431_p10 = pnand %p430_p4, %p697_p9 }
  0x71   : > { %p436_p5 = por %p435_p2, %p434_p1 }
  0x72   : > { %p432_p12 = pneg %p431_p10 }
  0x73   : > { %p438_p11 = por %p437_p8, %p436_p5 }
  0x75   : > { %p439_p0 = pnand %p438_p11, %p432_p12 }
  0x77   : > { %442 = shalt.err (!%p439_p0)
}
  0x78   : > { %317 = dma.vmem_to_hbm [thread:$0]  (%p697_p9), %s635_s27, 128, %s640_s3, %s198_s4  }
  0x79 PF: > { %s226_s25 = sand.u32 1, %s477_s6   ;;  %p698_p7 = scmp.ne.s32.totalorder %s693_s21, 0 }
  0x7a   : > { %p699_p13 = scmp.ge.s32.totalorder %s497_s11, 2  ;;  %s227_s26 = scalar_lea.sflag [#allocation4], %s226_s25 }
  0x7c   : > { %p324_p3 = pnand %p699_p13, %p698_p7 }
  0x7e   : > { %472 = dma.done.wait (!%p324_p3), %s227_s26, 128  }
  0x7f   : > { %474 = vsyncadd (!%p324_p3), %s227_s26, 4294967168  ;;  %s17_s11 = sadd.s32 1, %s497_s11   ;;  %s700_s6 = smov %s481_s7 }
  0x80   : > { %p14_p6 = scmp.ge.s32.totalorder %s17_s11, 4   ;;  %s701_s7 = smov %s485_s8 }
  0x81   : > { %s702_s8 = smov %s567_s20  ;;  %s703_s9 = smov %s493_s10 }
  0x82   : > { %s704_s10 = smov %s706_s14  ;;  %16 = sbr.rel (!%p14_p6) target bundleno = 6 (0x6), region = 69 }
  0x89   :  { %232 = vsyncpa [#allocation3], 1 }
  0x8a   :  { %234 = vsyncpa [#allocation3 + $0x1], 1 }
  0x8b   :  { %235 = vsyncpa [#allocation4], 1 }
  0x8c   :  { %237 = vsyncpa [#allocation4 + $0x1], 1 }

</bundles_post_ra>
